<compile_context>
chip_gen: v7x
topology: tpu7x:2x2x1
jax: 0.10.0
libtpu: 0.0.40
codegen_flags: <defaults>
</compile_context>

<pallas_src>
import functools

import jax
import jax.numpy as jnp
from jax.experimental import pallas as pl
from jax.experimental.pallas import tpu as pltpu


def _round_up(x, m):
    return ((x + m - 1) // m) * m


# ----------------------------- Pallas kernel ------------------------------ #
def _conv_bn_silu_kernel(xb_ref, w_ref, s_ref, b_ref, o_ref, acc_ref,
                         *, k, th, w_out):
    # xb_ref:  (1, th+k-1, W, k*C1) bf16  halo'd rows, kw taps folded into lanes
    # w_ref:   (k, k*C1, tn)        bf16  conv weight, (kw, C1) contraction order
    # s_ref:   (1, tn)              f32   BN scale  gamma / sqrt(var + eps)
    # b_ref:   (1, tn)              f32   BN bias   beta - mean * scale
    # o_ref:   (th*W, tn)           bf16  output rows, flattened (h, w)
    # acc_ref: (th*W, tn)           f32   VMEM scratch accumulator
    kc1 = w_ref.shape[1]
    for kh in range(k):                                  # unrolled: k MXU dots
        lhs = xb_ref[0, kh:kh + th].reshape(th * w_out, kc1)
        part = jnp.dot(lhs, w_ref[kh], preferred_element_type=jnp.float32)
        if kh == 0:
            acc_ref[...] = part
        else:
            acc_ref[...] += part
    y = acc_ref[...] * s_ref[...] + b_ref[...]           # BatchNorm (inference)
    o_ref[...] = (y * jax.nn.sigmoid(y)).astype(o_ref.dtype)   # SiLU


# ------------------------------ JAX wrapper -------------------------------- #
@functools.partial(jax.jit, static_argnames=("k", "eps", "th", "tn"))
def conv_bn_silu(x, weight, gamma, beta, running_mean, running_var,
                 *, k=3, eps=1e-5, th=None, tn=None):
    """SiLU(BN(Conv2d(x))) with stride 1, 'same' pad, bias=False (inference BN).

    x: (N, C1, H, W) NCHW, weight: (C2, C1, k, k) (PyTorch OIHW layout).
    th: output rows per grid step; tn: output-channel tile (lane multiple).
    """
    N, C1, H, W = x.shape
    C2 = weight.shape[0]
    pad = k // 2  # autopad(k, None, 1) for odd k

    if tn is None:
        tn = 128 if C2 <= 128 else 256          # v6e/v7x MXU likes N=256
    if th is None:
        divs = [d for d in range(1, H + 1) if H % d == 0]
        good = [d for d in divs if 256 <= d * W <= 4096]
        th = good[0] if good else divs[-1]      # divide H exactly, fill M dim

    C2p = _round_up(C2, tn)
    Hp = _round_up(H, th)
    Hb = Hp // th

    # ---- BatchNorm (inference) scale / bias, applied post-matmul in f32 ----
    scale = (gamma / jnp.sqrt(running_var + eps)).astype(jnp.float32)
    bias = (beta - running_mean * scale).astype(jnp.float32)
    s_k = jnp.pad(scale, (0, C2p - C2)).reshape(1, C2p)
    b_k = jnp.pad(bias, (0, C2p - C2)).reshape(1, C2p)

    # ---- weight: (C2,C1,kh,kw) -> (kh, kw*C1, C2p) bf16 ---------------------
    w_k = jnp.transpose(weight, (2, 3, 1, 0))                 # (kh, kw, C1, C2)
    w_k = jnp.pad(w_k, ((0, 0), (0, 0), (0, 0), (0, C2p - C2)))
    w_k = w_k.reshape(k, k * C1, C2p).astype(jnp.bfloat16)

    # ---- activation: NHWC bf16, pad, fold kw into lanes, halo'd row blocks --
    x_nhwc = jnp.transpose(x, (0, 2, 3, 1)).astype(jnp.bfloat16)
    xp = jnp.pad(x_nhwc, ((0, 0), (pad, pad + Hp - H), (pad, pad), (0, 0)))
    xw = jnp.stack([xp[:, :, kw:kw + W, :] for kw in range(k)], axis=3)
    xw = xw.reshape(N, Hp + k - 1, W, k * C1)
    if Hb == 1:
        xb = xw                                           # (N, th+k-1, W, k*C1)
    else:
        xb = jnp.stack([xw[:, i * th:i * th + th + (k - 1)] for i in range(Hb)],
                       axis=1)
        xb = xb.reshape(N * Hb, th + (k - 1), W, k * C1)

    # C2 tiles OUTER, row blocks INNER -> weight block resident across inner axis.
    grid = (C2p // tn, N * Hb)
    out = pl.pallas_call(
        functools.partial(_conv_bn_silu_kernel, k=k, th=th, w_out=W),
        out_shape=jax.ShapeDtypeStruct((N * Hp * W, C2p), jnp.bfloat16),
        grid_spec=pltpu.PrefetchScalarGridSpec(
            num_scalar_prefetch=0,
            grid=grid,
            in_specs=[
                pl.BlockSpec((1, th + (k - 1), W, k * C1),
                             lambda c, g: (g, 0, 0, 0)),
                pl.BlockSpec((k, k * C1, tn), lambda c, g: (0, 0, c)),
                pl.BlockSpec((1, tn), lambda c, g: (0, c)),
                pl.BlockSpec((1, tn), lambda c, g: (0, c)),
            ],
            out_specs=pl.BlockSpec((th * W, tn), lambda c, g: (g, c)),
            scratch_shapes=[pltpu.VMEM((th * W, tn), jnp.float32)],
        ),
        compiler_params=pltpu.CompilerParams(
            dimension_semantics=("parallel", "parallel")),
    )(xb, w_k, s_k, b_k)

    # Strip row / channel padding, back to NCHW (PyTorch I/O contract).
    out = out.reshape(N, Hp, W, C2p)[:, :H, :, :C2]
    return jnp.transpose(out, (0, 3, 1, 2)).astype(x.dtype)


# ------------------------------ reference ---------------------------------- #
def _reference(x, weight, gamma, beta, running_mean, running_var, k=3,
               eps=1e-5):
    pad = k // 2
    y = jax.lax.conv_general_dilated(
        x, weight, window_strides=(1, 1), padding=[(pad, pad), (pad, pad)],
        dimension_numbers=("NCHW", "OIHW", "NCHW"))
    scale = (gamma / jnp.sqrt(running_var + eps)).reshape(1, -1, 1, 1)
    bias = (beta - running_mean * gamma /
            jnp.sqrt(running_var + eps)).reshape(1, -1, 1, 1)
    y = y * scale + bias
    return y * jax.nn.sigmoid(y)


if __name__ == "__main__":
    key = jax.random.PRNGKey(0)
    k_x, k_w, k_g, k_b, k_m, k_v = jax.random.split(key, 6)

    N, C1, C2, H, W, K = 2, 4, 8, 16, 16, 3

    x = jax.random.normal(k_x, (N, C1, H, W), dtype=jnp.float32)
    weight = jax.random.normal(k_w, (C2, C1, K, K), dtype=jnp.float32) * 0.1
    gamma = jax.random.normal(k_g, (C2,), dtype=jnp.float32) * 0.1 + 1.0
    beta = jax.random.normal(k_b, (C2,), dtype=jnp.float32) * 0.1
    running_mean = jax.random.normal(k_m, (C2,), dtype=jnp.float32) * 0.1
    running_var = jnp.abs(jax.random.normal(k_v, (C2,), dtype=jnp.float32)) + 1.0

    out = conv_bn_silu(x, weight, gamma, beta, running_mean, running_var, k=K)
    out = jax.block_until_ready(out)

    ref = _reference(x, weight, gamma, beta, running_mean, running_var, k=K)
    assert out.shape == (N, C2, H, W), out.shape
    # bf16 operands / bf16 output with f32 accumulation -> loosened tolerance.
    max_err = float(jnp.max(jnp.abs(out - ref)))
    assert jnp.allclose(out, ref, atol=5e-2, rtol=5e-2), max_err

    print("KERNEL_OK")
</pallas_src>

<mosaic_0001>
module attributes {stable_mosaic.version = 11 : i64} {
  func.func @_conv_bn_silu_kernel(%arg0: i32, %arg1: i32, %arg2: memref<1x18x16x12xbf16, #tpu.memory_space<vmem>>, %arg3: memref<3x12x128xbf16, #tpu.memory_space<vmem>>, %arg4: memref<1x128xf32, #tpu.memory_space<vmem>>, %arg5: memref<1x128xf32, #tpu.memory_space<vmem>>, %arg6: memref<256x128xbf16, #tpu.memory_space<vmem>>, %arg7: memref<256x128xf32, #tpu.memory_space<vmem>>) attributes {dimension_semantics = [#tpu.dimension_semantics<parallel>, #tpu.dimension_semantics<parallel>], iteration_bounds = array<i64: 1, 2>, scalar_prefetch = 0 : i64, scratch_operands = 1 : i64, tpu.core_type = #tpu.core_type<tc>, window_params = [{transform_indices = @transform_0, window_bounds = array<i64: 1, 18, 16, 12>}, {transform_indices = @transform_1, window_bounds = array<i64: 3, 12, 128>}, {transform_indices = @transform_2, window_bounds = array<i64: 1, 128>}, {transform_indices = @transform_3, window_bounds = array<i64: 1, 128>}, {transform_indices = @transform_4, window_bounds = array<i64: 256, 128>}]} {
    %c0 = arith.constant 0 : index
    %c0_0 = arith.constant 0 : index
    %c0_1 = arith.constant 0 : index
    %c0_2 = arith.constant 0 : index
    %0 = vector.load %arg2[%c0, %c0_0, %c0_1, %c0_2] : memref<1x18x16x12xbf16, #tpu.memory_space<vmem>>, vector<1x16x16x12xbf16>
    %1 = vector.shape_cast %0 : vector<1x16x16x12xbf16> to vector<16x16x12xbf16>
    %2 = vector.shape_cast %1 : vector<16x16x12xbf16> to vector<256x12xbf16>
    %c0_3 = arith.constant 0 : index
    %c0_4 = arith.constant 0 : index
    %c0_5 = arith.constant 0 : index
    %3 = vector.load %arg3[%c0_3, %c0_4, %c0_5] : memref<3x12x128xbf16, #tpu.memory_space<vmem>>, vector<1x12x128xbf16>
    %4 = vector.shape_cast %3 : vector<1x12x128xbf16> to vector<12x128xbf16>
    %cst = arith.constant dense<0.000000e+00> : vector<256x128xf32>
    %5 = tpu.matmul %2, %4, %cst {dimension_numbers = #tpu.dot_dimension_numbers<[1], [0], [0], [1], [0, 0, 1, 1], [], []>} : vector<256x12xbf16>, vector<12x128xbf16>, vector<256x128xf32> -> vector<256x128xf32>
    %c0_6 = arith.constant 0 : index
    %c0_7 = arith.constant 0 : index
    %6 = vector.load %arg7[%c0_6, %c0_7] : memref<256x128xf32, #tpu.memory_space<vmem>>, vector<256x128xf32>
    tpu.vector_store %arg7[%c0_6, %c0_7], %5 {strides = array<i32>} : memref<256x128xf32, #tpu.memory_space<vmem>>, vector<256x128xf32>,
    %c0_8 = arith.constant 0 : index
    %c1 = arith.constant 1 : index
    %c0_9 = arith.constant 0 : index
    %c0_10 = arith.constant 0 : index
    %7 = vector.load %arg2[%c0_8, %c1, %c0_9, %c0_10] : memref<1x18x16x12xbf16, #tpu.memory_space<vmem>>, vector<1x16x16x12xbf16>
    %8 = vector.shape_cast %7 : vector<1x16x16x12xbf16> to vector<16x16x12xbf16>
    %9 = vector.shape_cast %8 : vector<16x16x12xbf16> to vector<256x12xbf16>
    %c1_11 = arith.constant 1 : index
    %c0_12 = arith.constant 0 : index
    %c0_13 = arith.constant 0 : index
    %10 = vector.load %arg3[%c1_11, %c0_12, %c0_13] : memref<3x12x128xbf16, #tpu.memory_space<vmem>>, vector<1x12x128xbf16>
    %11 = vector.shape_cast %10 : vector<1x12x128xbf16> to vector<12x128xbf16>
    %cst_14 = arith.constant dense<0.000000e+00> : vector<256x128xf32>
    %12 = tpu.matmul %9, %11, %cst_14 {dimension_numbers = #tpu.dot_dimension_numbers<[1], [0], [0], [1], [0, 0, 1, 1], [], []>} : vector<256x12xbf16>, vector<12x128xbf16>, vector<256x128xf32> -> vector<256x128xf32>
    %c0_15 = arith.constant 0 : index
    %c0_16 = arith.constant 0 : index
    %13 = vector.load %arg7[%c0_15, %c0_16] : memref<256x128xf32, #tpu.memory_space<vmem>>, vector<256x128xf32>
    %14 = arith.addf %13, %12 : vector<256x128xf32>
    %c0_17 = arith.constant 0 : index
    %c0_18 = arith.constant 0 : index
    %15 = vector.load %arg7[%c0_17, %c0_18] : memref<256x128xf32, #tpu.memory_space<vmem>>, vector<256x128xf32>
    tpu.vector_store %arg7[%c0_17, %c0_18], %14 {strides = array<i32>} : memref<256x128xf32, #tpu.memory_space<vmem>>, vector<256x128xf32>,
    %c0_19 = arith.constant 0 : index
    %c2 = arith.constant 2 : index
    %c0_20 = arith.constant 0 : index
    %c0_21 = arith.constant 0 : index
    %16 = vector.load %arg2[%c0_19, %c2, %c0_20, %c0_21] : memref<1x18x16x12xbf16, #tpu.memory_space<vmem>>, vector<1x16x16x12xbf16>
    %17 = vector.shape_cast %16 : vector<1x16x16x12xbf16> to vector<16x16x12xbf16>
    %18 = vector.shape_cast %17 : vector<16x16x12xbf16> to vector<256x12xbf16>
    %c2_22 = arith.constant 2 : index
    %c0_23 = arith.constant 0 : index
    %c0_24 = arith.constant 0 : index
    %19 = vector.load %arg3[%c2_22, %c0_23, %c0_24] : memref<3x12x128xbf16, #tpu.memory_space<vmem>>, vector<1x12x128xbf16>
    %20 = vector.shape_cast %19 : vector<1x12x128xbf16> to vector<12x128xbf16>
    %cst_25 = arith.constant dense<0.000000e+00> : vector<256x128xf32>
    %21 = tpu.matmul %18, %20, %cst_25 {dimension_numbers = #tpu.dot_dimension_numbers<[1], [0], [0], [1], [0, 0, 1, 1], [], []>} : vector<256x12xbf16>, vector<12x128xbf16>, vector<256x128xf32> -> vector<256x128xf32>
    %c0_26 = arith.constant 0 : index
    %c0_27 = arith.constant 0 : index
    %22 = vector.load %arg7[%c0_26, %c0_27] : memref<256x128xf32, #tpu.memory_space<vmem>>, vector<256x128xf32>
    %23 = arith.addf %22, %21 : vector<256x128xf32>
    %c0_28 = arith.constant 0 : index
    %c0_29 = arith.constant 0 : index
    %24 = vector.load %arg7[%c0_28, %c0_29] : memref<256x128xf32, #tpu.memory_space<vmem>>, vector<256x128xf32>
    tpu.vector_store %arg7[%c0_28, %c0_29], %23 {strides = array<i32>} : memref<256x128xf32, #tpu.memory_space<vmem>>, vector<256x128xf32>,
    %c0_30 = arith.constant 0 : index
    %c0_31 = arith.constant 0 : index
    %25 = vector.load %arg7[%c0_30, %c0_31] : memref<256x128xf32, #tpu.memory_space<vmem>>, vector<256x128xf32>
    %c0_32 = arith.constant 0 : index
    %c0_33 = arith.constant 0 : index
    %26 = vector.load %arg4[%c0_32, %c0_33] : memref<1x128xf32, #tpu.memory_space<vmem>>, vector<1x128xf32>
    %27 = vector.broadcast %26 : vector<1x128xf32> to vector<256x128xf32>
    %28 = arith.mulf %25, %27 : vector<256x128xf32>
    %c0_34 = arith.constant 0 : index
    %c0_35 = arith.constant 0 : index
    %29 = vector.load %arg5[%c0_34, %c0_35] : memref<1x128xf32, #tpu.memory_space<vmem>>, vector<1x128xf32>
    %30 = vector.broadcast %29 : vector<1x128xf32> to vector<256x128xf32>
    %31 = arith.addf %28, %30 : vector<256x128xf32>
    %32 = arith.negf %31 : vector<256x128xf32>
    %33 = math.exp %32 : vector<256x128xf32>
    %cst_36 = arith.constant 1.000000e+00 : f32
    %34 = vector.broadcast %cst_36 : f32 to vector<256x128xf32>
    %35 = arith.addf %34, %33 : vector<256x128xf32>
    %36 = arith.divf %34, %35 : vector<256x128xf32>
    %37 = arith.mulf %31, %36 : vector<256x128xf32>
    %38 = arith.truncf %37 : vector<256x128xf32> to vector<256x128xbf16>
    %c0_37 = arith.constant 0 : index
    %c0_38 = arith.constant 0 : index
    %39 = vector.load %arg6[%c0_37, %c0_38] : memref<256x128xbf16, #tpu.memory_space<vmem>>, vector<256x128xbf16>
    tpu.vector_store %arg6[%c0_37, %c0_38], %38 {strides = array<i32>} : memref<256x128xbf16, #tpu.memory_space<vmem>>, vector<256x128xbf16>,
    return
  }
  func.func @transform_0(%arg0: i32, %arg1: i32) -> (i32, i32, i32, i32) {
    %c0_i32 = arith.constant 0 : i32
    %c0_i32_0 = arith.constant 0 : i32
    %c0_i32_1 = arith.constant 0 : i32
    %c0_i32_2 = arith.constant 0 : i32
    return %arg1, %c0_i32, %c0_i32_0, %c0_i32_1 : i32, i32, i32, i32
  }
  func.func @transform_1(%arg0: i32, %arg1: i32) -> (i32, i32, i32) {
    %c0_i32 = arith.constant 0 : i32
    %c0_i32_0 = arith.constant 0 : i32
    %c0_i32_1 = arith.constant 0 : i32
    return %c0_i32, %c0_i32_0, %arg0 : i32, i32, i32
  }
  func.func @transform_2(%arg0: i32, %arg1: i32) -> (i32, i32) {
    %c0_i32 = arith.constant 0 : i32
    %c0_i32_0 = arith.constant 0 : i32
    return %c0_i32, %arg0 : i32, i32
  }
  func.func @transform_3(%arg0: i32, %arg1: i32) -> (i32, i32) {
    %c0_i32 = arith.constant 0 : i32
    %c0_i32_0 = arith.constant 0 : i32
    return %c0_i32, %arg0 : i32, i32
  }
  func.func @transform_4(%arg0: i32, %arg1: i32) -> (i32, i32) {
    %c0_i32 = arith.constant 0 : i32
    return %arg1, %arg0 : i32, i32
  }
}

</mosaic_0001>

<bundles_post_ra>
// kernel: conv_bn_silu.1
= control target key start
LH: loop header
LB: loop body
LE: loop exit
PB: predicated region body
PF: predicated region fallthrough
CT: control target
= control target key end

     0   :  { %s2945_s15 = smov 0   ;;  %s2947_s16 = smov 0   ;;  %s3345_s0 = inlined_call_operand.vmem [shape: bf16[2,18,16,12], index: 0, kind: input, shape index: {}]   ;;  %s3346_s1 = inlined_call_operand.vmem [shape: bf16[3,12,128], index: 1, kind: input, shape index: {}]   ;;  %s3347_s2 = inlined_call_operand.vmem [shape: f32[1,128], index: 2, kind: input, shape index: {}]   ;;  %s3348_s3 = inlined_call_operand.vmem [shape: f32[1,128], index: 3, kind: input, shape index: {}]   ;;  %s3349_s4 = inlined_call_operand.vmem [shape: bf16[512,128], index: 4, kind: output, shape index: {}]  }
   0x1   :  { %s2949_s17 = smov 0  }
   0x2 LB: > { %s23_s18 = sadd.s32 1, %s2914_s16  ;;  %p2103_p0 = scmp.ge.s32.totalorder %s2918_s17, 1  ;;  %s2918_s17 = sphi %s2949_s17, %s14_s17   ;;  %s2914_s16 = sphi %s2947_s16, %s3352_s16   ;;  %s2910_s15 = sphi %s2945_s15, %s3351_s15  }
   0x3   : > { %p24_p1 = scmp.ge.s32.totalorder %s23_s18, 2  ;;  %p201_p2 = scmp.lt.s32.totalorder %s2918_s17, 3 }
   0x5   : > { %s3354_s18 = smov (%p24_p1, %s23_s18), 0  ;;  %p202_p3 = pnand %p2103_p0, %p201_p2 }
   0x6   : > { %v2717_v0 = vld [vmem:[%s3346_s1] sm:$0x3f] (!%p202_p3)   ;;  %vm433_vm0 = vcmask (!%p202_p3), 1045504   ;;  %p240_p4 = scmp.lt.s32.totalorder (!%p202_p3), %s2910_s15, 1  ;;  %v2718_v1 = vld [vmem:[%s3346_s1 + $0x8] sm:$0x3f] (!%p202_p3)  }
   0x7   : > { %205 = sbr.rel (%p202_p3) target bundleno = 373 (0x175), region = 36  ;;  %2688 = vmatprep.subr.msk.bf16.mxu1 (!%p202_p3), %vm433_vm0, %v2717_v0  ;;  %v435_v2 = vsel (!%p202_p3), %vm433_vm0, %v2717_v0, 0  ;;  %v2721_v3 = vld [vmem:[%s3346_s1 + $0x10] sm:$0x3f] (!%p202_p3)   ;;  %2689 = vmatprep.subr.msk.bf16.mxu0 (!%p202_p3), %vm433_vm0, %v2718_v1  ;;  %v800_v4 = vsel (!%p202_p3), %vm433_vm0, %v2718_v1, 0  ;;  %vm384_vm1 = vcmask (!%p202_p3), 97280  }
   0x8   : > { %2521 = vmatpush3.bf16.msra.mxu1 (!%p202_p3), %v435_v2  ;;  %2555 = vmatpush3.bf16.msra.mxu0 (!%p202_p3), %v800_v4  ;;  %v1229_v9 = vsel (!%p202_p3), %vm433_vm0, %v2721_v3, 0  ;;  %s2105_s8 = sshll.u32 (!%p202_p3), %s2910_s15, 5 }
   0x9   : > { %2690 = vmatprep.subr.msk.bf16.mxu1 (!%p202_p3), %vm433_vm0, %v2718_v1  ;;  %2691 = vmatprep.subr.msk.bf16.mxu0 (!%p202_p3), %vm433_vm0, %v2721_v3  ;;  %p3166_p5 = scmp.lt.s32.totalorder (!%p202_p3), %s2105_s8, 63 }
   0xe   : > { %s241_s23 = scalar_select %p240_p4, %s2910_s15, 1 }
   0xf   : > { %s3356_s8 = smov (!%p3166_p5, %s2105_s8), 63 }
  0x10   : > { %s2692_s26 = smul.u32 144, %s241_s23  ;;  %s2106_s10 = sshll.u32 %s3356_s8, 2 }
  0x11   : > { %s3210_s13 = scalar_lea.vmem %s3349_s4, %s2106_s10 }
  0x12   : > { %s2985_s29 = scalar_lea.vmem %s3345_s0, %s2692_s26 }
  0x13   : > { %v2719_v5 = vld [vmem:[%s2985_s29] sm:$0xff]   ;;  %v2720_v6 = vld [vmem:[%s2985_s29 + $0x8] sm:$0xff]   ;;  %v2723_v8 = vld [vmem:[%s2985_s29 + $0x10] sm:$0xff]  }
  0x14   : > { %2522 = vmatprep.mubr.msk.bf16.mxu1 %vm384_vm1, %v2719_v5  ;;  %v2722_v7 = vld [vmem:[%s2985_s29 + $0x8] sm:$0xff]   ;;  %2556 = vmatprep.mubr.msk.bf16.mxu0 %vm384_vm1, %v2720_v6  ;;  %v2724_v10 = vld [vmem:[%s2985_s29 + $0x10] sm:$0xff]   ;;  %v2725_v11 = vld [vmem:[%s2985_s29 + $0x18] sm:$0xff]  }
  0x15   : > { %2523 = vmatmul.mubr.msk.bf16.vlgmr.msra.gmra.mrb[0].mxu1 %vm384_vm1, %v2722_v7  ;;  %2557 = vmatmul.mubr.msk.bf16.vlgmr.msra.gmra.mrb[0].mxu0 %vm384_vm1, %v2723_v8  ;;  %v2726_v12 = vld [vmem:[%s2985_s29 + $0x18] sm:$0xff]   ;;  %v2727_v13 = vld [vmem:[%s2985_s29 + $0x20] sm:$0xff]   ;;  %v2729_v15 = vld [vmem:[%s2985_s29 + $0x28] sm:$0xff]  }
  0x16   : > { %2623 = vmatpush3.bf16.msra.mxu1 %v800_v4  ;;  %2589 = vmatpush3.bf16.msra.mxu0 %v1229_v9  ;;  %v2728_v14 = vld [vmem:[%s2985_s29 + $0x20] sm:$0xff]   ;;  %v2730_v16 = vld [vmem:[%s2985_s29 + $0x28] sm:$0xff]   ;;  %v2731_v17 = vld [vmem:[%s2985_s29 + $0x30] sm:$0xff]  }
  0x17   : > { %2526 = vmatprep.mubr.msk.bf16.mxu1 %vm384_vm1, %v2724_v10  ;;  %2560 = vmatprep.mubr.msk.bf16.mxu0 %vm384_vm1, %v2725_v11  ;;  %v2732_v18 = vld [vmem:[%s2985_s29 + $0x30] sm:$0xff]   ;;  %v2733_v19 = vld [vmem:[%s2985_s29 + $0x38] sm:$0xff]   ;;  %v2735_v21 = vld [vmem:[%s2985_s29 + $0x40] sm:$0xff]  }
  0x18   : > { %v2734_v20 = vld [vmem:[%s2985_s29 + $0x38] sm:$0xff]   ;;  %v2736_v22 = vld [vmem:[%s2985_s29 + $0x40] sm:$0xff]   ;;  %v2737_v23 = vld [vmem:[%s2985_s29 + $0x10] sm:$0xff]  }
  0x19   : > { %v2738_v24 = vld [vmem:[%s2985_s29 + $0x48] sm:$0xff]   ;;  %v2739_v25 = vld [vmem:[%s2985_s29 + $0x18] sm:$0xff]   ;;  %v2740_v26 = vld [vmem:[%s2985_s29 + $0x50] sm:$0xff]  }
  0x1a   : > { %v2741_v27 = vld [vmem:[%s2985_s29 + $0x20] sm:$0xff]   ;;  %v2742_v28 = vld [vmem:[%s2985_s29 + $0x58] sm:$0xff]   ;;  %v2743_v29 = vld [vmem:[%s2985_s29 + $0x28] sm:$0xff]  }
  0x1b   : > { %v2744_v30 = vld [vmem:[%s2985_s29 + $0x60] sm:$0xff]   ;;  %v2745_v31 = vld [vmem:[%s2985_s29 + $0x30] sm:$0xff]   ;;  %v2746_v32 = vld [vmem:[%s2985_s29 + $0x68] sm:$0xff]  }
  0x1c   : > { %v2747_v33 = vld [vmem:[%s2985_s29 + $0x38] sm:$0xff]   ;;  %v2748_v34 = vld [vmem:[%s2985_s29 + $0x70] sm:$0xff]   ;;  %v2749_v35 = vld [vmem:[%s2985_s29 + $0x40] sm:$0xff]  }
  0x1d   : > { %2527 = vmatmul.mubr.msk.bf16.gmra.mrb[4].mxu1 %vm384_vm1, %v2726_v12  ;;  %2561 = vmatmul.mubr.msk.bf16.gmra.mrb[4].mxu0 %vm384_vm1, %v2727_v13  ;;  %v2750_v36 = vld [vmem:[%s2985_s29 + $0x78] sm:$0xff]   ;;  %v2751_v37 = vld [vmem:[%s2985_s29 + $0x48] sm:$0xff]   ;;  %v2753_v39 = vld [vmem:[%s2985_s29 + $0x50] sm:$0xff]  }
  0x1e   : > { %2530 = vmatprep.mubr.msk.bf16.mxu1 %vm384_vm1, %v2728_v14  ;;  %2564 = vmatprep.mubr.msk.bf16.mxu0 %vm384_vm1, %v2729_v15  ;;  %v2752_v38 = vld [vmem:[%s2985_s29 + $0x48] sm:$0xff]   ;;  %v2754_v40 = vld [vmem:[%s2985_s29 + $0x50] sm:$0xff]   ;;  %v2755_v41 = vld [vmem:[%s2985_s29 + $0x58] sm:$0xff]  }
  0x1f   : > { %v2756_v42 = vld [vmem:[%s2985_s29 + $0x58] sm:$0xff]   ;;  %v2757_v43 = vld [vmem:[%s2985_s29 + $0x60] sm:$0xff]   ;;  %v2759_v45 = vld [vmem:[%s2985_s29 + $0x68] sm:$0xff]  }
  0x20   : > { %v2758_v44 = vld [vmem:[%s2985_s29 + $0x60] sm:$0xff]   ;;  %v2760_v46 = vld [vmem:[%s2985_s29 + $0x68] sm:$0xff]   ;;  %v2761_v47 = vld [vmem:[%s2985_s29 + $0x70] sm:$0xff]  }
  0x21   : > { %v2762_v48 = vld [vmem:[%s2985_s29 + $0x70] sm:$0xff]   ;;  %v2763_v49 = vld [vmem:[%s2985_s29 + $0x78] sm:$0xff]   ;;  %v2765_v51 = vld [vmem:[%s2985_s29 + $0x80] sm:$0xff]  }
  0x22   : > { %v2764_v50 = vld [vmem:[%s2985_s29 + $0x78] sm:$0xff]   ;;  %v2766_v52 = vld [vmem:[%s2985_s29 + $0x80] sm:$0xff]   ;;  %v2767_v53 = vld [vmem:[%s2985_s29 + $0x88] sm:$0xff]  }
  0x23   : > { %v3097_v7 = vld [vmem:[%s3347_s2] ss:$0 sm:$0xff] }
  0x24   : > { %v3102_v10 = vld [vmem:[%s3348_s3] ss:$0 sm:$0xff] }
  0x25   : > { %2531 = vmatmul.mubr.msk.bf16.gmra.mrb[8].mxu1 %vm384_vm1, %v2730_v16  ;;  %2565 = vmatmul.mubr.msk.bf16.gmra.mrb[8].mxu0 %vm384_vm1, %v2731_v17 }
  0x26   : > { %2534 = vmatprep.mubr.msk.bf16.mxu1 %vm384_vm1, %v2732_v18  ;;  %2568 = vmatprep.mubr.msk.bf16.mxu0 %vm384_vm1, %v2733_v19 }
  0x2d   : > { %2535 = vmatmul.mubr.msk.bf16.gmra.mrb[12].mxu1 %vm384_vm1, %v2734_v20  ;;  %2569 = vmatmul.mubr.msk.bf16.gmra.mrb[12].mxu0 %vm384_vm1, %v2735_v21 }
  0x2e   : > { %2538 = vmatprep.mubr.msk.bf16.mxu1 %vm384_vm1, %v2736_v22  ;;  %2590 = vmatprep.mubr.msk.bf16.mxu0 %vm384_vm1, %v2737_v23 }
  0x35   : > { %2539 = vmatmul.mubr.msk.bf16.gmra.mrb[16].mxu1 %vm384_vm1, %v2738_v24  ;;  %2591 = vmatmul.mubr.msk.bf16.vlgmr.msra.gmra.mrb[0].mxu0 %vm384_vm1, %v2739_v25 }
  0x36   : > { %2542 = vmatprep.mubr.msk.bf16.mxu1 %vm384_vm1, %v2740_v26  ;;  %2594 = vmatprep.mubr.msk.bf16.mxu0 %vm384_vm1, %v2741_v27 }
  0x3d   : > { %2543 = vmatmul.mubr.msk.bf16.gmra.mrb[20].mxu1 %vm384_vm1, %v2742_v28  ;;  %2595 = vmatmul.mubr.msk.bf16.gmra.mrb[4].mxu0 %vm384_vm1, %v2743_v29 }
  0x3e   : > { %2546 = vmatprep.mubr.msk.bf16.mxu1 %vm384_vm1, %v2744_v30  ;;  %2598 = vmatprep.mubr.msk.bf16.mxu0 %vm384_vm1, %v2745_v31 }
  0x45   : > { %2547 = vmatmul.mubr.msk.bf16.gmra.mrb[24].mxu1 %vm384_vm1, %v2746_v32  ;;  %2599 = vmatmul.mubr.msk.bf16.gmra.mrb[8].mxu0 %vm384_vm1, %v2747_v33 }
  0x46   : > { %2550 = vmatprep.mubr.msk.bf16.mxu1 %vm384_vm1, %v2748_v34  ;;  %2602 = vmatprep.mubr.msk.bf16.mxu0 %vm384_vm1, %v2749_v35 }
  0x4d   : > { %2551 = vmatmul.mubr.msk.bf16.gmra.mrb[28].mxu1 %vm384_vm1, %v2750_v36  ;;  %2603 = vmatmul.mubr.msk.bf16.gmra.mrb[12].mxu0 %vm384_vm1, %v2751_v37 }
  0x4e   : > { %2572 = vmatprep.mubr.msk.bf16.mxu1 %vm384_vm1, %v2752_v38  ;;  %2606 = vmatprep.mubr.msk.bf16.mxu0 %vm384_vm1, %v2753_v39 }
  0x55   : > { %2573 = vmatmul.mubr.msk.bf16.vlgmr.msra.gmra.mrb[16].mxu1 %vm384_vm1, %v2754_v40  ;;  %2607 = vmatmul.mubr.msk.bf16.gmra.mrb[16].mxu0 %vm384_vm1, %v2755_v41 }
  0x56   : > { %2576 = vmatprep.mubr.msk.bf16.mxu1 %vm384_vm1, %v2756_v42  ;;  %2610 = vmatprep.mubr.msk.bf16.mxu0 %vm384_vm1, %v2757_v43 }
  0x5d   : > { %2577 = vmatmul.mubr.msk.bf16.gmra.mrb[20].mxu1 %vm384_vm1, %v2758_v44  ;;  %2611 = vmatmul.mubr.msk.bf16.gmra.mrb[20].mxu0 %vm384_vm1, %v2759_v45 }
  0x5e   : > { %2580 = vmatprep.mubr.msk.bf16.mxu1 %vm384_vm1, %v2760_v46  ;;  %2614 = vmatprep.mubr.msk.bf16.mxu0 %vm384_vm1, %v2761_v47 }
  0x65   : > { %2581 = vmatmul.mubr.msk.bf16.gmra.mrb[24].mxu1 %vm384_vm1, %v2762_v48  ;;  %2615 = vmatmul.mubr.msk.bf16.gmra.mrb[24].mxu0 %vm384_vm1, %v2763_v49 }
  0x66   : > { %2584 = vmatprep.mubr.msk.bf16.mxu1 %vm384_vm1, %v2764_v50  ;;  %2618 = vmatprep.mubr.msk.bf16.mxu0 %vm384_vm1, %v2765_v51 }
  0x6d   : > { %2585 = vmatmul.mubr.msk.bf16.gmra.mrb[28].mxu1 %vm384_vm1, %v2766_v52  ;;  %2619 = vmatmul.mubr.msk.bf16.gmra.mrb[28].mxu0 %vm384_vm1, %v2767_v53 }
  0xe8   : > { %v2524_v54 = vpop.f32.mrb[0].mxu1 }
  0xe9   : > { %v471_v55 = vpop.f32.mrb[1].mxu1 }
  0xea   : > { %v2525_v56 = vpop.f32.mrb[2].mxu1 }
  0xeb   : > { %v474_v57 = vpop.f32.mrb[3].mxu1 }
  0xf0   : > { %v2528_v58 = vpop.f32.mrb[4].mxu1 }
  0xf1   : > { %v487_v59 = vpop.f32.mrb[5].mxu1 }
  0xf2   : > { %v2529_v60 = vpop.f32.mrb[6].mxu1 }
  0xf3   : > { %v490_v61 = vpop.f32.mrb[7].mxu1 }
  0xf8   : > { %v2532_v62 = vpop.f32.mrb[8].mxu1 }
  0xf9   : > { %v503_v63 = vpop.f32.mrb[9].mxu1 }
  0xfa   : > { %v2533_v0 = vpop.f32.mrb[10].mxu1 }
  0xfb   : > { %v3084_v1 = vpop.f32.mrb[11].mxu1 }
 0x100   : > { %v3086_v2 = vpop.f32.mrb[12].mxu1 }
 0x101   : > { %v3088_v3 = vpop.f32.mrb[13].mxu1 }
 0x102   : > { %v3090_v4 = vpop.f32.mrb[14].mxu1 }
 0x103   : > { %v3092_v5 = vpop.f32.mrb[15].mxu1 }
 0x108   : > { %v2592_v6 = vpop.f32.mrb[0].mxu0 }
 0x109   : > { %v2624_v8 = vadd.f32 %v2592_v6, %v2524_v54  ;;  %v1265_v9 = vpop.f32.mrb[1].mxu0 }
 0x10a   : > { %v2625_v11 = vadd.f32 %v1265_v9, %v471_v55  ;;  %v2593_v12 = vpop.f32.mrb[2].mxu0 }
 0x10b   : > { %v1529_v13 = vmul.f32 %v2624_v8, %v3097_v7  ;;  %v2626_v14 = vadd.f32 %v2593_v12, %v2525_v56  ;;  %v1268_v15 = vpop.f32.mrb[3].mxu0 }
 0x10c   : > { %v1527_v16 = vmul.f32 %v2625_v11, %v3097_v7  ;;  %v2627_v17 = vadd.f32 %v1268_v15, %v474_v57 }
 0x10d   : > { %v3107_v18 = vadd.f32 %v3102_v10, %v1529_v13  ;;  %v1530_v19 = vmul.f32 %v2626_v14, %v3097_v7 }
 0x10e   : > { %v3111_v20 = vadd.f32 %v3102_v10, %v1527_v16  ;;  %v1528_v21 = vmul.f32 %v2627_v17, %v3097_v7 }
 0x10f   : > { %v2278_v22 = vmul.f32 -1.442695, %v3107_v18  ;;  %v3116_v23 = vadd.f32 %v3102_v10, %v1530_v19 }
 0x110   : > { %v2276_v24 = vmul.f32 -1.442695, %v3111_v20  ;;  %v3120_v25 = vadd.f32 %v3102_v10, %v1528_v21  ;;  %v2596_v26 = vpop.f32.mrb[4].mxu0 }
 0x111   : > { %2768 = vpow2.f32 %v2278_v22  ;;  %v2279_v27 = vmul.f32 -1.442695, %v3116_v23  ;;  %v2628_v28 = vadd.f32 %v2596_v26, %v2528_v58  ;;  %v1281_v29 = vpop.f32.mrb[5].mxu0 }
 0x112   : > { %2770 = vpow2.f32 %v2276_v24  ;;  %v2277_v30 = vmul.f32 -1.442695, %v3120_v25  ;;  %v2629_v31 = vadd.f32 %v1281_v29, %v487_v59  ;;  %v2597_v32 = vpop.f32.mrb[6].mxu0 }
 0x113   : > { %2772 = vpow2.f32 %v2279_v27  ;;  %v1533_v33 = vmul.f32 %v2628_v28, %v3097_v7  ;;  %v2630_v34 = vadd.f32 %v2597_v32, %v2529_v60  ;;  %v1284_v35 = vpop.f32.mrb[7].mxu0 }
 0x114   : > { %2774 = vpow2.f32 %v2277_v30  ;;  %v1531_v36 = vmul.f32 %v2629_v31, %v3097_v7  ;;  %v2631_v37 = vadd.f32 %v1284_v35, %v490_v61 }
 0x115   : > { %v3127_v38 = vadd.f32 %v3102_v10, %v1533_v33  ;;  %v1534_v39 = vmul.f32 %v2630_v34, %v3097_v7 }
 0x116   : > { %v3131_v40 = vadd.f32 %v3102_v10, %v1531_v36  ;;  %v1532_v41 = vmul.f32 %v2631_v37, %v3097_v7 }
 0x117   : > { %v2282_v42 = vmul.f32 -1.442695, %v3127_v38  ;;  %v3136_v43 = vadd.f32 %v3102_v10, %v1534_v39 }
 0x118   : > { %v2280_v44 = vmul.f32 -1.442695, %v3131_v40  ;;  %v3140_v45 = vadd.f32 %v3102_v10, %v1532_v41  ;;  %v2600_v46 = vpop.f32.mrb[8].mxu0 }
 0x119   : > { %2776 = vpow2.f32 %v2282_v42  ;;  %v2283_v47 = vmul.f32 -1.442695, %v3136_v43  ;;  %v2632_v48 = vadd.f32 %v2600_v46, %v2532_v62  ;;  %v1297_v49 = vpop.f32.mrb[9].mxu0 }
 0x11a   : > { %2778 = vpow2.f32 %v2280_v44  ;;  %v2281_v50 = vmul.f32 -1.442695, %v3140_v45  ;;  %v2633_v51 = vadd.f32 %v1297_v49, %v503_v63  ;;  %v2601_v52 = vpop.f32.mrb[10].mxu0 }
 0x11b   : > { %v2769_v53 = vpop.eup %2768  ;;  %2780 = vpow2.f32 %v2283_v47  ;;  %v1537_v54 = vmul.f32 %v2632_v48, %v3097_v7  ;;  %v2634_v55 = vadd.f32 %v2601_v52, %v2533_v0  ;;  %v1300_v56 = vpop.f32.mrb[11].mxu0 }
 0x11c   : > { %v2771_v57 = vpop.eup %2770  ;;  %v1696_v58 = vadd.f32 1.0, %v2769_v53  ;;  %2782 = vpow2.f32 %v2281_v50  ;;  %v1535_v59 = vmul.f32 %v2633_v51, %v3097_v7  ;;  %v2635_v60 = vadd.f32 %v1300_v56, %v3084_v1 }
 0x11d   : > { %v2773_v61 = vpop.eup %2772  ;;  %v1694_v62 = vadd.f32 1.0, %v2771_v57  ;;  %v3148_v6 = vadd.f32 %v3102_v10, %v1537_v54  ;;  %v1538_v63 = vmul.f32 %v2634_v55, %v3097_v7 }
 0x11e   : > { %v2775_v8 = vpop.eup %2774  ;;  %2784 = vrcp.f32 %v1696_v58  ;;  %v1697_v0 = vadd.f32 1.0, %v2773_v61  ;;  %v3153_v9 = vadd.f32 %v3102_v10, %v1535_v59  ;;  %v1536_v11 = vmul.f32 %v2635_v60, %v3097_v7 }
 0x11f   : > { %2786 = vrcp.f32 %v1694_v62  ;;  %v1695_v12 = vadd.f32 1.0, %v2775_v8  ;;  %v2286_v1 = vmul.f32 -1.442695, %v3148_v6  ;;  %v3158_v13 = vadd.f32 %v3102_v10, %v1538_v63 }
 0x120   : > { %2788 = vrcp.f32 %v1697_v0  ;;  %v2284_v14 = vmul.f32 -1.442695, %v3153_v9  ;;  %v3162_v15 = vadd.f32 %v3102_v10, %v1536_v11  ;;  %v2604_v16 = vpop.f32.mrb[12].mxu0 }
 0x121   : > { %2790 = vrcp.f32 %v1695_v12  ;;  %v2287_v17 = vmul.f32 -1.442695, %v3158_v13  ;;  %v2636_v19 = vadd.f32 %v2604_v16, %v3086_v2  ;;  %v1313_v21 = vpop.f32.mrb[13].mxu0 }
 0x122   : > { %2792 = vpow2.f32 %v2286_v1  ;;  %v2285_v22 = vmul.f32 -1.442695, %v3162_v15  ;;  %v2637_v24 = vadd.f32 %v1313_v21, %v3088_v3  ;;  %v2605_v26 = vpop.f32.mrb[14].mxu0 }
 0x123   : > { %v2777_v27 = vpop.eup %2776  ;;  %2794 = vpow2.f32 %v2284_v14  ;;  %v1541_v28 = vmul.f32 %v2636_v19, %v3097_v7  ;;  %v2638_v29 = vadd.f32 %v2605_v26, %v3090_v4  ;;  %v1316_v30 = vpop.f32.mrb[15].mxu0 }
 0x124   : > { %v2779_v31 = vpop.eup %2778  ;;  %v1700_v32 = vadd.f32 1.0, %v2777_v27  ;;  %2796 = vpow2.f32 %v2287_v17  ;;  %v1539_v2 = vmul.f32 %v2637_v24, %v3097_v7  ;;  %v2639_v33 = vadd.f32 %v1316_v30, %v3092_v5 }
 0x125   : > { %v2781_v34 = vpop.eup %2780  ;;  %v1698_v3 = vadd.f32 1.0, %v2779_v31  ;;  %2798 = vpow2.f32 %v2285_v22  ;;  %v3185_v35 = vadd.f32 %v3102_v10, %v1541_v28  ;;  %v1542_v4 = vmul.f32 %v2638_v29, %v3097_v7 }
 0x126   : > { %v2783_v36 = vpop.eup %2782  ;;  %2800 = vrcp.f32 %v1700_v32  ;;  %v1701_v37 = vadd.f32 1.0, %v2781_v34  ;;  %v3189_v39 = vadd.f32 %v3102_v10, %v1539_v2  ;;  %v1540_v5 = vmul.f32 %v2639_v33, %v3097_v7 }
 0x127   : > { %2802 = vrcp.f32 %v1698_v3  ;;  %v1699_v41 = vadd.f32 1.0, %v2783_v36  ;;  %v2290_v42 = vmul.f32 -1.442695, %v3185_v35  ;;  %v3194_v44 = vadd.f32 %v3102_v10, %v1542_v4 }
 0x128   : > { %v2574_v46 = vpop.f32.mrb[16].mxu1  ;;  %v2785_v47 = vpop.eup %2784  ;;  %2804 = vrcp.f32 %v1701_v37  ;;  %v2288_v48 = vmul.f32 -1.442695, %v3189_v39  ;;  %v3198_v49 = vadd.f32 %v3102_v10, %v1540_v5 }
 0x129   : > { %v2608_v50 = vpop.f32.mrb[16].mxu0  ;;  %v900_v51 = vpop.f32.mrb[17].mxu1  ;;  %v1792_v53 = vmul.f32 %v2785_v47, %v3107_v18  ;;  %2806 = vrcp.f32 %v1699_v41  ;;  %v2291_v54 = vmul.f32 -1.442695, %v3194_v44 }
 0x12a   : > { %v2787_v52 = vpop.eup %2786  ;;  %v2640_v55 = vadd.f32 %v2608_v50, %v2574_v46  ;;  %v1329_v56 = vpop.f32.mrb[17].mxu0  ;;  %2808 = vpow2.f32 %v2290_v42  ;;  %v2289_v60 = vmul.f32 -1.442695, %v3198_v49 }
 0x12b   : > { %v2575_v57 = vpop.f32.mrb[18].mxu1  ;;  %v2789_v58 = vpop.eup %2788  ;;  %v1790_v59 = vmul.f32 %v2787_v52, %v3111_v20  ;;  %v2641_v61 = vadd.f32 %v1329_v56, %v900_v51  ;;  %2810 = vpow2.f32 %v2288_v48 }
 0x12c   : > { %v2609_v62 = vpop.f32.mrb[18].mxu0  ;;  %v903_v63 = vpop.f32.mrb[19].mxu1  ;;  %v1793_v0 = vmul.f32 %v2789_v58, %v3116_v23  ;;  %v1545_v18 = vmul.f32 %v2640_v55, %v3097_v7  ;;  %2812 = vpow2.f32 %v2291_v54 }
 0x12d   : > { %v2791_v8 = vpop.eup %2790  ;;  %v2642_v11 = vadd.f32 %v2609_v62, %v2575_v57  ;;  %v1332_v12 = vpop.f32.mrb[19].mxu0  ;;  %v1543_v14 = vmul.f32 %v2641_v61, %v3097_v7  ;;  %2814 = vpow2.f32 %v2289_v60 }
 0x12e   : > { %v2793_v1 = vpop.eup %2792  ;;  %v1791_v20 = vmul.f32 %v2791_v8, %v3120_v25  ;;  %v2643_v16 = vadd.f32 %v1332_v12, %v903_v63  ;;  %v2382_v23 = vpack.c.bf16 %v1793_v0, %v1792_v53  ;;  %v3215_v21 = vadd.f32 %v3102_v10, %v1545_v18 }
 0x12f   : > { %v2795_v17 = vpop.eup %2794  ;;  %v1704_v19 = vadd.f32 1.0, %v2793_v1  ;;  %v3218_v27 = vadd.f32 %v3102_v10, %v1543_v14  ;;  %v1546_v25 = vmul.f32 %v2642_v11, %v3097_v7 }
 0x130   : > { %v2797_v22 = vpop.eup %2796  ;;  %v2377_v24 = vpack.c.bf16 %v1791_v20, %v1790_v59  ;;  %v1702_v26 = vadd.f32 1.0, %v2795_v17  ;;  %2454 = vst [vmem:[%s3210_s13 + $0x8] sm:$0xff] %v2382_v23   ;;  %v2294_v30 = vmul.f32 -1.442695, %v3215_v21  ;;  %v1544_v31 = vmul.f32 %v2643_v16, %v3097_v7  ;;  %v2578_v32 = vpop.f32.mrb[20].mxu1 }
 0x131   : > { %v2799_v28 = vpop.eup %2798  ;;  %2816 = vrcp.f32 %v1704_v19  ;;  %v1705_v29 = vadd.f32 1.0, %v2797_v22  ;;  %v2292_v34 = vmul.f32 -1.442695, %v3218_v27  ;;  %v3227_v3 = vadd.f32 %v3102_v10, %v1546_v25  ;;  %v2612_v4 = vpop.f32.mrb[20].mxu0 }
 0x132   : > { %v2801_v2 = vpop.eup %2800  ;;  %2378 = vst [vmem:[%s3210_s13] sm:$0xff] %v2377_v24   ;;  %2818 = vrcp.f32 %v1702_v26  ;;  %v1703_v33 = vadd.f32 1.0, %v2799_v28  ;;  %v916_v36 = vpop.f32.mrb[21].mxu1  ;;  %v3231_v41 = vadd.f32 %v3102_v10, %v1544_v31  ;;  %v2644_v42 = vadd.f32 %v2612_v4, %v2578_v32 }
 0x133   : > { %v2803_v37 = vpop.eup %2802  ;;  %v1796_v5 = vmul.f32 %v2801_v2, %v3127_v38  ;;  %2820 = vrcp.f32 %v1705_v29  ;;  %v1345_v46 = vpop.f32.mrb[21].mxu0  ;;  %v2295_v51 = vmul.f32 -1.442695, %v3227_v3 }
 0x134   : > { %v2579_v47 = vpop.f32.mrb[22].mxu1  ;;  %v2805_v48 = vpop.eup %2804  ;;  %v1794_v50 = vmul.f32 %v2803_v37, %v3131_v40  ;;  %2822 = vrcp.f32 %v1703_v33  ;;  %v2645_v52 = vadd.f32 %v1345_v46, %v916_v36  ;;  %v2293_v38 = vmul.f32 -1.442695, %v3231_v41 }
 0x135   : > { %v2613_v53 = vpop.f32.mrb[22].mxu0  ;;  %v919_v54 = vpop.f32.mrb[23].mxu1  ;;  %v1797_v56 = vmul.f32 %v2805_v48, %v3136_v43  ;;  %2824 = vpow2.f32 %v2294_v30  ;;  %v1549_v57 = vmul.f32 %v2644_v42, %v3097_v7 }
 0x136   : > { %v2807_v55 = vpop.eup %2806  ;;  %v1348_v58 = vpop.f32.mrb[23].mxu0  ;;  %2826 = vpow2.f32 %v2292_v34  ;;  %v1547_v40 = vmul.f32 %v2645_v52, %v3097_v7  ;;  %v2646_v61 = vadd.f32 %v2613_v53, %v2579_v47 }
 0x137   : > { %v2809_v59 = vpop.eup %2808  ;;  %v1795_v60 = vmul.f32 %v2807_v55, %v3140_v45  ;;  %v2392_v63 = vpack.c.bf16 %v1797_v56, %v1796_v5  ;;  %2828 = vpow2.f32 %v2295_v51  ;;  %v3241_v43 = vadd.f32 %v3102_v10, %v1549_v57 }
 0x138   : > { %v2811_v62 = vpop.eup %2810  ;;  %v1708_v8 = vadd.f32 1.0, %v2809_v59  ;;  %2830 = vpow2.f32 %v2293_v38  ;;  %v3244_v12 = vadd.f32 %v3102_v10, %v1547_v40  ;;  %v1550_v14 = vmul.f32 %v2646_v61, %v3097_v7  ;;  %v2582_v16 = vpop.f32.mrb[24].mxu1 }
 0x139   : > { %v2813_v0 = vpop.eup %2812  ;;  %v2387_v18 = vpack.c.bf16 %v1795_v60, %v1794_v50  ;;  %v1706_v11 = vadd.f32 1.0, %v2811_v62  ;;  %2456 = vst [vmem:[%s3210_s13 + $0x18] sm:$0xff] %v2392_v63   ;;  %v2298_v20 = vmul.f32 -1.442695, %v3241_v43  ;;  %v2647_v19 = vadd.f32 %v1348_v58, %v919_v54  ;;  %v2616_v22 = vpop.f32.mrb[24].mxu0 }
 0x13a   : > { %v2815_v45 = vpop.eup %2814  ;;  %2832 = vrcp.f32 %v1708_v8  ;;  %v1709_v1 = vadd.f32 1.0, %v2813_v0  ;;  %v2296_v23 = vmul.f32 -1.442695, %v3244_v12  ;;  %v932_v24 = vpop.f32.mrb[25].mxu1  ;;  %v3252_v25 = vadd.f32 %v3102_v10, %v1550_v14 }
 0x13b   : > { %2455 = vst [vmem:[%s3210_s13 + $0x10] sm:$0xff] %v2387_v18   ;;  %2834 = vrcp.f32 %v1706_v11  ;;  %v1707_v17 = vadd.f32 1.0, %v2815_v45  ;;  %v2817_v26 = vpop.eup %2816  ;;  %v2648_v28 = vadd.f32 %v2616_v22, %v2582_v16  ;;  %v1361_v29 = vpop.f32.mrb[25].mxu0  ;;  %v1548_v2 = vmul.f32 %v2647_v19, %v3097_v7 }
 0x13c   : > { %2836 = vrcp.f32 %v1709_v1  ;;  %v2583_v30 = vpop.f32.mrb[26].mxu1  ;;  %v2819_v31 = vpop.eup %2818  ;;  %v1800_v32 = vmul.f32 %v2817_v26, %v3148_v6  ;;  %v2649_v33 = vadd.f32 %v1361_v29, %v932_v24  ;;  %v2299_v5 = vmul.f32 -1.442695, %v3252_v25 }
 0x13d   : > { %2838 = vrcp.f32 %v1707_v17  ;;  %v2617_v34 = vpop.f32.mrb[26].mxu0  ;;  %v935_v4 = vpop.f32.mrb[27].mxu1  ;;  %v1798_v37 = vmul.f32 %v2819_v31, %v3153_v9  ;;  %v1553_v42 = vmul.f32 %v2648_v28, %v3097_v7  ;;  %v3261_v6 = vadd.f32 %v3102_v10, %v1548_v2 }
 0x13e   : > { %v2821_v36 = vpop.eup %2820  ;;  %2840 = vpow2.f32 %v2298_v20  ;;  %v1364_v46 = vpop.f32.mrb[27].mxu0  ;;  %v1551_v50 = vmul.f32 %v2649_v33, %v3097_v7  ;;  %v2650_v53 = vadd.f32 %v2617_v34, %v2583_v30 }
 0x13f   : > { %v2823_v47 = vpop.eup %2822  ;;  %v1801_v48 = vmul.f32 %v2821_v36, %v3158_v13  ;;  %2842 = vpow2.f32 %v2296_v23  ;;  %v3266_v9 = vadd.f32 %v3102_v10, %v1553_v42  ;;  %v2297_v13 = vmul.f32 -1.442695, %v3261_v6 }
 0x140   : > { %v2825_v51 = vpop.eup %2824  ;;  %v1799_v52 = vmul.f32 %v2823_v47, %v3162_v15  ;;  %2844 = vpow2.f32 %v2299_v5  ;;  %v3270_v38 = vadd.f32 %v3102_v10, %v1551_v50  ;;  %v1554_v60 = vmul.f32 %v2650_v53, %v3097_v7  ;;  %v2586_v40 = vpop.f32.mrb[28].mxu1 }
 0x141   : > { %v2827_v54 = vpop.eup %2826  ;;  %v2402_v55 = vpack.c.bf16 %v1801_v48, %v1800_v32  ;;  %v1712_v56 = vadd.f32 1.0, %v2825_v51  ;;  %v2302_v15 = vmul.f32 -1.442695, %v3266_v9  ;;  %v2651_v8 = vadd.f32 %v1364_v46, %v935_v4  ;;  %v2620_v0 = vpop.f32.mrb[28].mxu0 }
 0x142   : > { %v2829_v57 = vpop.eup %2828  ;;  %v2397_v58 = vpack.c.bf16 %v1799_v52, %v1798_v37  ;;  %v1710_v59 = vadd.f32 1.0, %v2827_v54  ;;  %v2300_v63 = vmul.f32 -1.442695, %v3270_v38  ;;  %v948_v18 = vpop.f32.mrb[29].mxu1  ;;  %v3278_v1 = vadd.f32 %v3102_v10, %v1554_v60 }
 0x143   : > { %v2831_v61 = vpop.eup %2830  ;;  %2458 = vst [vmem:[%s3210_s13 + $0x28] sm:$0xff] %v2402_v55   ;;  %2846 = vrcp.f32 %v1712_v56  ;;  %v1713_v62 = vadd.f32 1.0, %v2829_v57  ;;  %v2652_v20 = vadd.f32 %v2620_v0, %v2586_v40  ;;  %v1377_v14 = vpop.f32.mrb[29].mxu0  ;;  %v1552_v19 = vmul.f32 %v2651_v8, %v3097_v7 }
 0x144   : > { %v2833_v11 = vpop.eup %2832  ;;  %2457 = vst [vmem:[%s3210_s13 + $0x20] sm:$0xff] %v2397_v58   ;;  %2848 = vrcp.f32 %v1710_v59  ;;  %v1711_v45 = vadd.f32 1.0, %v2831_v61  ;;  %v2587_v16 = vpop.f32.mrb[30].mxu1  ;;  %v2653_v22 = vadd.f32 %v1377_v14, %v948_v18  ;;  %v2303_v30 = vmul.f32 -1.442695, %v3278_v1 }
 0x145   : > { %v2835_v17 = vpop.eup %2834  ;;  %v1804_v23 = vmul.f32 %v2833_v11, %v3185_v35  ;;  %2850 = vrcp.f32 %v1713_v62  ;;  %v2621_v24 = vpop.f32.mrb[30].mxu0  ;;  %v1557_v31 = vmul.f32 %v2652_v20, %v3097_v7  ;;  %v3287_v35 = vadd.f32 %v3102_v10, %v1552_v19 }
 0x146   : > { %v951_v26 = vpop.f32.mrb[31].mxu1  ;;  %v2837_v28 = vpop.eup %2836  ;;  %v1802_v29 = vmul.f32 %v2835_v17, %v3189_v39  ;;  %2852 = vrcp.f32 %v1711_v45  ;;  %v1555_v34 = vmul.f32 %v2653_v22, %v3097_v7  ;;  %v2654_v37 = vadd.f32 %v2621_v24, %v2587_v16 }
 0x147   : > { %v1380_v32 = vpop.f32.mrb[31].mxu0  ;;  %v2839_v2 = vpop.eup %2838  ;;  %v1805_v33 = vmul.f32 %v2837_v28, %v3194_v44  ;;  %2854 = vpow2.f32 %v2297_v13  ;;  %v3292_v39 = vadd.f32 %v3102_v10, %v1557_v31  ;;  %v2301_v48 = vmul.f32 -1.442695, %v3287_v35 }
 0x148   : > { %v2841_v4 = vpop.eup %2840  ;;  %v1803_v36 = vmul.f32 %v2839_v2, %v3198_v49  ;;  %2856 = vpow2.f32 %v2302_v15  ;;  %v3298_v51 = vadd.f32 %v3102_v10, %v1555_v34  ;;  %v1558_v52 = vmul.f32 %v2654_v37, %v3097_v7 }
 0x149   : > { %v2843_v5 = vpop.eup %2842  ;;  %v2412_v42 = vpack.c.bf16 %v1805_v33, %v1804_v23  ;;  %v1716_v46 = vadd.f32 1.0, %v2841_v4  ;;  %2858 = vpow2.f32 %v2300_v63  ;;  %v2306_v50 = vmul.f32 -1.442695, %v3292_v39 }
 0x14a   : > { %v2845_v44 = vpop.eup %2844  ;;  %v2407_v47 = vpack.c.bf16 %v1803_v36, %v1802_v29  ;;  %2860 = vpow2.f32 %v2303_v30  ;;  %v1714_v53 = vadd.f32 1.0, %v2843_v5  ;;  %v2655_v54 = vadd.f32 %v1380_v32, %v951_v26 }
 0x14b   : > { %2460 = vst [vmem:[%s3210_s13 + $0x38] sm:$0xff] %v2412_v42   ;;  %2862 = vrcp.f32 %v1716_v46  ;;  %v1717_v49 = vadd.f32 1.0, %v2845_v44  ;;  %v3303_v56 = vadd.f32 %v3102_v10, %v1558_v52  ;;  %v2304_v57 = vmul.f32 -1.442695, %v3298_v51 }
 0x14c   : > { %2459 = vst [vmem:[%s3210_s13 + $0x30] sm:$0xff] %v2407_v47   ;;  %v1556_v58 = vmul.f32 %v2655_v54, %v3097_v7 }
 0x14d   : > { %v2847_v55 = vpop.eup %2846  ;;  %2864 = vrcp.f32 %v1717_v49  ;;  %v2307_v15 = vmul.f32 -1.442695, %v3303_v56 }
 0x14e   : > { %v2849_v13 = vpop.eup %2848  ;;  %2866 = vpow2.f32 %v2301_v48  ;;  %v1808_v40 = vmul.f32 %v2847_v55, %v3215_v21  ;;  %v3311_v62 = vadd.f32 %v3102_v10, %v1556_v58 }
 0x14f   : > { %v2851_v59 = vpop.eup %2850  ;;  %2868 = vpow2.f32 %v2306_v50  ;;  %v1806_v8 = vmul.f32 %v2849_v13, %v3218_v27 }
 0x150   : > { %v2853_v60 = vpop.eup %2852  ;;  %v1809_v61 = vmul.f32 %v2851_v59, %v3227_v3  ;;  %2870 = vrcp.f32 %v1714_v53  ;;  %v2305_v10 = vmul.f32 -1.442695, %v3311_v62 }
 0x151   : > { %v2855_v63 = vpop.eup %2854  ;;  %v1807_v7 = vmul.f32 %v2853_v60, %v3231_v41  ;;  %2872 = vpow2.f32 %v2307_v15 }
 0x152   : > { %v2857_v0 = vpop.eup %2856  ;;  %v2422_v18 = vpack.c.bf16 %v1809_v61, %v1808_v40  ;;  %v1715_v11 = vadd.f32 1.0, %v2855_v63  ;;  %2874 = vpow2.f32 %v2304_v57 }
 0x153   : > { %v2859_v45 = vpop.eup %2858  ;;  %v2417_v21 = vpack.c.bf16 %v1807_v7, %v1806_v8  ;;  %v1720_v20 = vadd.f32 1.0, %v2857_v0 }
 0x154   : > { %v2861_v14 = vpop.eup %2860  ;;  %2462 = vst [vmem:[%s3210_s13 + $0x48] sm:$0xff] %v2422_v18   ;;  %2876 = vrcp.f32 %v1715_v11  ;;  %v1718_v16 = vadd.f32 1.0, %v2859_v45 }
 0x155   : > { %v2863_v3 = vpop.eup %2862  ;;  %2461 = vst [vmem:[%s3210_s13 + $0x40] sm:$0xff] %v2417_v21   ;;  %2878 = vrcp.f32 %v1720_v20  ;;  %v1721_v27 = vadd.f32 1.0, %v2861_v14 }
 0x156   : > { %v1812_v23 = vmul.f32 %v2863_v3, %v3241_v43 }
 0x157   : > { %v2865_v41 = vpop.eup %2864  ;;  %2880 = vrcp.f32 %v1721_v27 }
 0x158   : > { %v2867_v17 = vpop.eup %2866  ;;  %v1813_v19 = vmul.f32 %v2865_v41, %v3252_v25  ;;  %2882 = vpow2.f32 %v2305_v10 }
 0x159   : > { %v2869_v22 = vpop.eup %2868  ;;  %2884 = vrcp.f32 %v1718_v16  ;;  %v1719_v24 = vadd.f32 1.0, %v2867_v17 }
 0x15a   : > { %v2871_v26 = vpop.eup %2870  ;;  %v2432_v28 = vpack.c.bf16 %v1813_v19, %v1812_v23  ;;  %v1724_v29 = vadd.f32 1.0, %v2869_v22 }
 0x15b   : > { %v2873_v30 = vpop.eup %2872  ;;  %2886 = vrcp.f32 %v1719_v24  ;;  %v1810_v43 = vmul.f32 %v2871_v26, %v3244_v12 }
 0x15c   : > { %v2875_v31 = vpop.eup %2874  ;;  %2464 = vst [vmem:[%s3210_s13 + $0x58] sm:$0xff] %v2432_v28   ;;  %2888 = vrcp.f32 %v1724_v29  ;;  %v1725_v32 = vadd.f32 1.0, %v2873_v30 }
 0x15d   : > { %v1722_v34 = vadd.f32 1.0, %v2875_v31 }
 0x15e   : > { %v2877_v2 = vpop.eup %2876  ;;  %2890 = vrcp.f32 %v1725_v32 }
 0x15f   : > { %v2879_v33 = vpop.eup %2878  ;;  %v1811_v25 = vmul.f32 %v2877_v2, %v3261_v6  ;;  %2892 = vrcp.f32 %v1722_v34 }
 0x160   : > { %v1816_v5 = vmul.f32 %v2879_v33, %v3266_v9 }
 0x161   : > { %v2881_v4 = vpop.eup %2880  ;;  %v2427_v36 = vpack.c.bf16 %v1811_v25, %v1810_v43 }
 0x162   : > { %v2883_v37 = vpop.eup %2882  ;;  %v1817_v42 = vmul.f32 %v2881_v4, %v3278_v1 }
 0x163   : > { %v2885_v46 = vpop.eup %2884  ;;  %2463 = vst [vmem:[%s3210_s13 + $0x50] sm:$0xff] %v2427_v36   ;;  %v1723_v44 = vadd.f32 1.0, %v2883_v37 }
 0x164   : > { %v2442_v47 = vpack.c.bf16 %v1817_v42, %v1816_v5  ;;  %v1814_v6 = vmul.f32 %v2885_v46, %v3270_v38 }
 0x165   : > { %v2887_v48 = vpop.eup %2886  ;;  %2894 = vrcp.f32 %v1723_v44 }
 0x166   : > { %v2889_v12 = vpop.eup %2888  ;;  %2466 = vst [vmem:[%s3210_s13 + $0x68] sm:$0xff] %v2442_v47   ;;  %v1815_v50 = vmul.f32 %v2887_v48, %v3287_v35 }
 0x167   : > { %v1820_v1 = vmul.f32 %v2889_v12, %v3292_v39 }
 0x168   : > { %v2891_v49 = vpop.eup %2890  ;;  %v2437_v9 = vpack.c.bf16 %v1815_v50, %v1814_v6 }
 0x169   : > { %v1821_v52 = vmul.f32 %v2891_v49, %v3303_v56  ;;  %v2893_v54 = vpop.eup %2892 }
 0x16a   : > { %2465 = vst [vmem:[%s3210_s13 + $0x60] sm:$0xff] %v2437_v9   ;;  %v1818_v13 = vmul.f32 %v2893_v54, %v3298_v51 }
 0x16b   : > { %v2452_v53 = vpack.c.bf16 %v1821_v52, %v1820_v1 }
 0x16d   : > { %2468 = vst [vmem:[%s3210_s13 + $0x78] sm:$0xff] %v2452_v53  }
 0x16f   : > { %v2895_v55 = vpop.eup %2894 }
 0x170   : > { %v1819_v57 = vmul.f32 %v2895_v55, %v3311_v62 }
 0x172   : > { %v2447_v58 = vpack.c.bf16 %v1819_v57, %v1818_v13 }
 0x174   : > { %2467 = vst [vmem:[%s3210_s13 + $0x70] sm:$0xff] %v2447_v58  }
 0x175 PF: > { %s14_s17 = sadd.s32 1, %s2918_s17   ;;  %s3351_s15 = smov %s2914_s16 }
 0x176   : > { %p11_p6 = scmp.ge.s32.totalorder %s14_s17, 4   ;;  %s3352_s16 = smov %s3354_s18 }
 0x178   :  { %13 = sbr.rel (!%p11_p6) target bundleno = 2 (0x2), region = 79 }

</bundles_post_ra>
